<compile_context>
chip_gen: v7x
topology: tpu7x:2x2x1
jax: 0.10.0
libtpu: 0.0.40
codegen_flags: <defaults>
</compile_context>

<pallas_src>
import jax
import jax.numpy as jnp
from jax.experimental import pallas as pl
from jax.experimental.pallas import tpu as pltpu

C_IN, L_IN = 16, 49
K0, C0 = 37, 10          # f0: Conv1d(16 -> 10, k=37)  => L: 49 -> 13
K1, C1 = 13, 25          # f1: Conv1d(10 -> 25, k=13)  => L: 13 -> 1
C2 = 56                  # f2: Conv1d(25 -> 56, k=1)
C3 = 10                  # f3: Conv1d(56 -> 10, k=1)
L0 = L_IN - K0 + 1       # 13
D_IN = C_IN * L_IN       # 784
N_PAD = 128              # lane-dense (padded) class dimension
NEG_BIG = -1e30          # "minus infinity" for padded class columns (finite in f32)


def _round_up(n, m):
    return ((n + m - 1) // m) * m


def _pick_tile(B):
    """Batch tile: multiple of 8, big enough to amortize the ~0.35us/step
    pipeline overhead, small enough to keep >=2 grid steps for the v7x
    dual-TensorCore split when the batch allows."""
    try:
        kind = jax.devices()[0].device_kind.lower()
    except Exception:  # pragma: no cover - defensive only
        kind = ""
    cap = 1024 if "v5" in kind else 2048          # v5e: 16 MiB scoped default
    tb = min(cap, _round_up(B, 8))
    # Prefer at least 2 grid steps (both v7x TCs busy, DMA/compute overlap)
    # while never shrinking tiles below 512 rows (~85%+ of HBM roofline).
    while tb >= 1024 and pl.cdiv(B, tb) < 2:
        tb //= 2
    return tb


# --------------------------------------------------------------------------
# Kernel: one matmul + bias + log_softmax per batch tile.
# --------------------------------------------------------------------------
def net_kernel(x_ref, w_ref, b_ref, out_ref):
    """x_ref: (TB, 784); w_ref: (784, 128); b_ref: (1, 128); out_ref: (TB, 128)."""
    logits = jnp.dot(x_ref[...], w_ref[...],
                     preferred_element_type=jnp.float32) + b_ref[...]
    # log_softmax over the lane axis; padded lanes carry -1e30 bias so their
    # exp underflows to exactly 0 and they do not perturb the normalizer.
    m = jnp.max(logits, axis=-1, keepdims=True)
    s = logits - m
    lse = jnp.log(jnp.sum(jnp.exp(s), axis=-1, keepdims=True))
    out_ref[...] = (s - lse).astype(out_ref.dtype)


# --------------------------------------------------------------------------
# One-time parameter folding (wrapper-side glue, pure weight algebra).
# --------------------------------------------------------------------------
def fold_params(p):
    """Fold f0..f3 into W_pad (784, 128) and b_pad (1, 128)."""
    w0, b0 = p["w0"], p["b0"]                 # (10,16,37), (10,)
    w1, b1 = p["w1"], p["b1"]                 # (25,10,13), (25,)
    w2, b2 = p["w2"][:, :, 0], p["b2"]        # (56,25),    (56,)
    w3, b3 = p["w3"][:, :, 0], p["b3"]        # (10,56),    (10,)

    # f1(f0(x)) linear part:  M1[c, l, p] = sum_{t+k=l} sum_o w0[o,c,k]*w1[p,o,t]
    M1 = jnp.zeros((C_IN, L_IN, C1), jnp.float32)
    for t in range(L0):                                      # param-prep only
        contrib = jnp.einsum('ock,po->ckp', w0, w1[:, :, t])  # (16,37,25)
        M1 = M1.at[:, t:t + K0, :].add(contrib)
    b01 = b1 + jnp.einsum('pot,o->p', w1, b0)                # (25,)

    # Chain the two 1x1 convs (plain dense layers).
    W_all = M1.reshape(D_IN, C1) @ w2.T @ w3.T               # (784, 10)
    b_all = (b01 @ w2.T + b2) @ w3.T + b3                    # (10,)

    # Pad to a lane-dense 128-wide class axis.
    W_pad = jnp.zeros((D_IN, N_PAD), jnp.float32).at[:, :C3].set(W_all)
    b_pad = jnp.full((1, N_PAD), NEG_BIG, jnp.float32).at[0, :C3].set(b_all)
    return W_pad, b_pad


# --------------------------------------------------------------------------
# Forward wrapper.
# --------------------------------------------------------------------------
def conv1donly_11(x, w_pad, b_pad):
    """x: (B, 1, 28, 28) float32 -> (B, 10) log-probabilities."""
    B = x.shape[0]
    x_flat = x.reshape(B, D_IN).astype(jnp.float32)   # same data as .view(B,16,49)

    TB = _pick_tile(B)
    n_blocks = pl.cdiv(B, TB)   # ragged last block; OOB rows discarded below

    cost = pl.CostEstimate(
        flops=2 * n_blocks * TB * D_IN * N_PAD,
        transcendentals=n_blocks * TB * N_PAD,
        bytes_accessed=(B * D_IN + D_IN * N_PAD + N_PAD + B * N_PAD) * 4,
    )

    out = pl.pallas_call(
        net_kernel,
        out_shape=jax.ShapeDtypeStruct((B, N_PAD), jnp.float32),
        grid=(n_blocks,),
        in_specs=[
            pl.BlockSpec((TB, D_IN), lambda i: (i, 0)),      # activations: tiled
            pl.BlockSpec((D_IN, N_PAD), lambda i: (0, 0)),   # folded weight: resident
            pl.BlockSpec((1, N_PAD), lambda i: (0, 0)),      # folded bias: resident
        ],
        out_specs=pl.BlockSpec((TB, N_PAD), lambda i: (i, 0)),
        compiler_params=pltpu.CompilerParams(
            dimension_semantics=("parallel",),
            vmem_limit_bytes=32 * 1024 * 1024,
        ),
        cost_estimate=cost,
    )(x_flat, w_pad, b_pad)

    # Lane slice only (no batch pad to undo); fuses with downstream ops under jit.
    return out[:, :C3]


# --------------------------------------------------------------------------
# Params + pure-JAX reference (matches the PyTorch module).
# --------------------------------------------------------------------------
def init_params(key):
    """Deterministic init mimicking PyTorch Conv1d defaults (U(-s, s))."""
    shapes = {
        "w0": (C0, C_IN, K0), "b0": (C0,),
        "w1": (C1, C0, K1),   "b1": (C1,),
        "w2": (C2, C1, 1),    "b2": (C2,),
        "w3": (C3, C2, 1),    "b3": (C3,),
    }
    fan_in = {
        "w0": C_IN * K0, "b0": C_IN * K0,
        "w1": C0 * K1,   "b1": C0 * K1,
        "w2": C1 * 1,    "b2": C1 * 1,
        "w3": C2 * 1,    "b3": C2 * 1,
    }
    params = {}
    keys = jax.random.split(key, len(shapes))
    for k_rng, (name, shape) in zip(keys, sorted(shapes.items())):
        bound = 1.0 / jnp.sqrt(jnp.float32(fan_in[name]))
        params[name] = jax.random.uniform(
            k_rng, shape, jnp.float32, minval=-bound, maxval=bound)
    return params


def reference_forward(x, p):
    def conv1d(a, w, b):
        y = jax.lax.conv_general_dilated(
            a, w, window_strides=(1,), padding="VALID",
            dimension_numbers=("NCH", "OIH", "NCH"))
        return y + b[None, :, None]

    y = x.reshape(x.shape[0], C_IN, L_IN).astype(jnp.float32)
    y = conv1d(y, p["w0"], p["b0"])
    y = conv1d(y, p["w1"], p["b1"])
    y = conv1d(y, p["w2"], p["b2"])
    y = conv1d(y, p["w3"], p["b3"])
    y = y.reshape(y.shape[0], C3)
    return jax.nn.log_softmax(y, axis=1)


if __name__ == "__main__":
    key = jax.random.PRNGKey(0)
    kx, kp = jax.random.split(key)
    x = jax.random.normal(kx, (2, 1, 28, 28), jnp.float32)   # NCHW MNIST-style
    params = init_params(kp)

    # One-time parameter fold (done outside the per-step forward path).
    w_pad, b_pad = fold_params(params)

    fwd = jax.jit(conv1donly_11)
    out = fwd(x, w_pad, b_pad)
    out = jax.block_until_ready(out)

    ref = reference_forward(x, params)
    assert out.shape == (2, 10)
    assert bool(jnp.allclose(out, ref, atol=1e-3, rtol=1e-3)), (
        f"mismatch: max abs err {jnp.max(jnp.abs(out - ref))}")
    print("KERNEL_OK")
</pallas_src>

<mosaic_0001>
module attributes {stable_mosaic.version = 11 : i64} {
  func.func @net_kernel(%arg0: i32, %arg1: memref<8x784xf32, #tpu.memory_space<vmem>>, %arg2: memref<784x128xf32, #tpu.memory_space<vmem>>, %arg3: memref<1x128xf32, #tpu.memory_space<vmem>>, %arg4: memref<8x128xf32, #tpu.memory_space<vmem>>) attributes {dimension_semantics = [#tpu.dimension_semantics<parallel>], iteration_bounds = array<i64: 1>, scalar_prefetch = 0 : i64, scratch_operands = 0 : i64, tpu.core_type = #tpu.core_type<tc>, window_params = [{transform_indices = @transform_0, window_bounds = array<i64: 8, 784>}, {pipeline_mode = #tpu.pipeline_mode<synchronous>, transform_indices = @transform_1, window_bounds = array<i64: 784, 128>}, {pipeline_mode = #tpu.pipeline_mode<synchronous>, transform_indices = @transform_2, window_bounds = array<i64: 1, 128>}, {transform_indices = @transform_3, window_bounds = array<i64: 8, 128>}]} {
    %c0 = arith.constant 0 : index
    %c0_0 = arith.constant 0 : index
    %0 = vector.load %arg1[%c0, %c0_0] : memref<8x784xf32, #tpu.memory_space<vmem>>, vector<8x784xf32>
    %c0_1 = arith.constant 0 : index
    %c0_2 = arith.constant 0 : index
    %1 = vector.load %arg2[%c0_1, %c0_2] : memref<784x128xf32, #tpu.memory_space<vmem>>, vector<784x128xf32>
    %cst = arith.constant dense<0.000000e+00> : vector<8x128xf32>
    %2 = tpu.matmul %0, %1, %cst {dimension_numbers = #tpu.dot_dimension_numbers<[1], [0], [0], [1], [0, 0, 1, 1], [], []>} : vector<8x784xf32>, vector<784x128xf32>, vector<8x128xf32> -> vector<8x128xf32>
    %c0_3 = arith.constant 0 : index
    %c0_4 = arith.constant 0 : index
    %3 = vector.load %arg3[%c0_3, %c0_4] : memref<1x128xf32, #tpu.memory_space<vmem>>, vector<1x128xf32>
    %4 = vector.broadcast %3 : vector<1x128xf32> to vector<8x128xf32>
    %5 = arith.addf %2, %4 : vector<8x128xf32>
    %cst_5 = arith.constant dense<0xFF800000> : vector<8xf32>
    %6 = vector.multi_reduction <maximumf>, %5, %cst_5 [1] : vector<8x128xf32> to vector<8xf32>
    %7 = vector.shape_cast %6 : vector<8xf32> to vector<8x1xf32>
    %8 = vector.broadcast %7 : vector<8x1xf32> to vector<8x128xf32>
    %9 = arith.subf %5, %8 : vector<8x128xf32>
    %10 = math.exp %9 : vector<8x128xf32>
    %cst_6 = arith.constant dense<0.000000e+00> : vector<8xf32>
    %11 = vector.multi_reduction <add>, %10, %cst_6 [1] : vector<8x128xf32> to vector<8xf32>
    %12 = vector.shape_cast %11 : vector<8xf32> to vector<8x1xf32>
    %13 = math.log %12 : vector<8x1xf32>
    %14 = vector.broadcast %13 : vector<8x1xf32> to vector<8x128xf32>
    %15 = arith.subf %9, %14 : vector<8x128xf32>
    %c0_7 = arith.constant 0 : index
    %c0_8 = arith.constant 0 : index
    %16 = vector.load %arg4[%c0_7, %c0_8] : memref<8x128xf32, #tpu.memory_space<vmem>>, vector<8x128xf32>
    tpu.vector_store %arg4[%c0_7, %c0_8], %15 {strides = array<i32>} : memref<8x128xf32, #tpu.memory_space<vmem>>, vector<8x128xf32>,
    return
  }
  func.func @transform_0(%arg0: i32) -> (i32, i32) {
    %c0_i32 = arith.constant 0 : i32
    %c0_i32_0 = arith.constant 0 : i32
    return %arg0, %c0_i32 : i32, i32
  }
  func.func @transform_1(%arg0: i32) -> (i32, i32) {
    %c0_i32 = arith.constant 0 : i32
    %c0_i32_0 = arith.constant 0 : i32
    %c0_i32_1 = arith.constant 0 : i32
    return %c0_i32, %c0_i32_0 : i32, i32
  }
  func.func @transform_2(%arg0: i32) -> (i32, i32) {
    %c0_i32 = arith.constant 0 : i32
    %c0_i32_0 = arith.constant 0 : i32
    %c0_i32_1 = arith.constant 0 : i32
    return %c0_i32, %c0_i32_0 : i32, i32
  }
  func.func @transform_3(%arg0: i32) -> (i32, i32) {
    %c0_i32 = arith.constant 0 : i32
    %c0_i32_0 = arith.constant 0 : i32
    return %arg0, %c0_i32 : i32, i32
  }
}

</mosaic_0001>

<bundles_post_ra>
// kernel: conv1donly_11.1
= control target key start
LH: loop header
LB: loop body
LE: loop exit
PB: predicated region body
PF: predicated region fallthrough
CT: control target
= control target key end

     0   :  { %8 = vsyncpa [#allocation3], 0  ;;  %s919_s0 = inlined_call_operand.vmem [shape: f32[2,784], index: 0, kind: input, shape index: {}]   ;;  %s920_s1 = inlined_call_operand.hbm [shape: f32[784,128], index: 1, kind: input, shape index: {}]   ;;  %s921_s2 = inlined_call_operand.vmem [shape: f32[1,128], index: 2, kind: input, shape index: {}]   ;;  %s922_s3 = inlined_call_operand.hbm [shape: f32[2,128], index: 3, kind: output, shape index: {}]  }
   0x1   :  { %9 = vsyncpa [#allocation4], 0  ;;  %s828_s12 = smov [#allocation2]   ;;  %s780_s16 = scalar_lea.hbm %s920_s1, 12544 }
   0x2   :  { %s17_s13 = sshll.u32 %s828_s12, 4  ;;  %p781_p0 = scmp.ne.s32.totalorder %s920_s1, %s780_s16  ;;  %s18_s13 = int_to_ptr.vmem [resolvable:$true] %s17_s13 }
   0x3   :  { %p784_p1 = scmp.lt.u32.totalorder %s780_s16, %s920_s1 }
   0x5   :  { %p786_p2 = pnand %p784_p1, %p781_p0 }
   0x7   :  { %789 = shalt.err (!%p786_p2)
}
   0x8   :  { %s790_s21 = scalar_lea.vmem %s18_s13, 12544  ;;  %p795_p4 = scmp.lt.s32.totalorder %s18_s13, %s18_s13 }
   0x9   :  { %p791_p3 = scmp.ne.s32.totalorder %s18_s13, %s790_s21  ;;  %p796_p5 = scmp.lt.s32.totalorder %s790_s21, %s790_s21 }
   0xb   :  { %p797_p6 = por %p796_p5, %p795_p4 }
   0xd   :  { %p798_p7 = pnand %p797_p6, %p791_p3 }
   0xf   :  { %801 = shalt.err (!%p798_p7)
}
  0x10   :  { %s829_s22 = smov 128   ;;  %s830_s23 = smov 8  }
  0x11   :  { %23 = dma.hbm_to_vmem [thread:$0]  %s920_s1, 12544, %s18_s13, [#allocation3], %s829_s22, %s829_s22, %s830_s23  }
  0x12   :  { %824 = dma.done.wait [#allocation3], 12544  }
  0x13   :  { %825 = vsyncadd [#allocation3], 4294954752  ;;  %v53_v0 = vld [vmem:[#allocation2 + $0x80] sm:$0xff]  ;;  %v54_v1 = vld [vmem:[#allocation2 + $0x88] sm:$0xff]  ;;  %v831_v51 = vmov 1983009808   ;;  %v157_v53 = vlaneseq }
  0x14   :  { %v37_v2 = vld [vmem:[#allocation2] sm:$0xff]  ;;  %v655_v3 = vpack.c.bf16 %v54_v1, %v53_v0  ;;  %v38_v4 = vld [vmem:[#allocation2 + $0x8] sm:$0xff]  ;;  %v55_v11 = vld [vmem:[#allocation2 + $0x90] sm:$0xff]  ;;  %v155_v52 = vunpack.c.l.s4 %v831_v51  ;;  %vm833_vm0 = vmmov 0   ;;  %vm227_vm1 = vcmask 130048  }
  0x15   :  { %v85_v5 = vld [vmem:[#allocation2 + $0x180] sm:$0xff]  ;;  %v86_v6 = vld [vmem:[#allocation2 + $0x188] sm:$0xff]  ;;  %v657_v7 = vpack.c.bf16 %v38_v4, %v37_v2  ;;  %v56_v13 = vld [vmem:[#allocation2 + $0x98] sm:$0xff] }
  0x16   :  { %v687_v8 = vpack.c.bf16 %v86_v6, %v85_v5  ;;  %v69_v9 = vld [vmem:[#allocation2 + $0x100] sm:$0xff]  ;;  %v70_v10 = vld [vmem:[#allocation2 + $0x108] sm:$0xff]  ;;  %656 = vmatprep.subr.bf16.mxu0 %v655_v3  ;;  %v39_v14 = vld [vmem:[#allocation2 + $0x10] sm:$0xff]  ;;  %v659_v16 = vpack.c.bf16 %v56_v13, %v55_v11  ;;  %v156_v2 = vunpack.c.0.s8 %v155_v52  ;;  %v158_v3 = vshrl.u32 %v157_v53, 7 }
  0x17   :  { %v689_v12 = vpack.c.bf16 %v70_v10, %v69_v9  ;;  %v40_v15 = vld [vmem:[#allocation2 + $0x18] sm:$0xff]  ;;  %658 = vmatpush3.bf16.msra.mxu0 %v657_v7  ;;  %v87_v18 = vld [vmem:[#allocation2 + $0x190] sm:$0xff]  ;;  %v57_v23 = vld [vmem:[#allocation2 + $0xa0] sm:$0xff] }
  0x18   :  { %688 = vmatprep.subr.bf16.mxu1 %v687_v8  ;;  %v661_v17 = vpack.c.bf16 %v40_v15, %v39_v14  ;;  %v88_v19 = vld [vmem:[#allocation2 + $0x198] sm:$0xff]  ;;  %v71_v20 = vld [vmem:[#allocation2 + $0x110] sm:$0xff]  ;;  %v58_v24 = vld [vmem:[#allocation2 + $0xa8] sm:$0xff]  ;;  %660 = vmatprep.subr.bf16.mxu0 %v659_v16 }
  0x19   :  { %690 = vmatpush3.bf16.msra.mxu1 %v689_v12  ;;  %v691_v21 = vpack.c.bf16 %v88_v19, %v87_v18  ;;  %v72_v22 = vld [vmem:[#allocation2 + $0x118] sm:$0xff]  ;;  %v663_v26 = vpack.c.bf16 %v58_v24, %v57_v23  ;;  %v41_v27 = vld [vmem:[#allocation2 + $0x20] sm:$0xff]  ;;  %v42_v28 = vld [vmem:[#allocation2 + $0x28] sm:$0xff] }
  0x1a   :  { %v693_v25 = vpack.c.bf16 %v72_v22, %v71_v20  ;;  %v89_v29 = vld [vmem:[#allocation2 + $0x1a0] sm:$0xff]  ;;  %v90_v30 = vld [vmem:[#allocation2 + $0x1a8] sm:$0xff]  ;;  %v665_v33 = vpack.c.bf16 %v42_v28, %v41_v27  ;;  %v59_v35 = vld [vmem:[#allocation2 + $0xb0] sm:$0xff] }
  0x1b   :  { %692 = vmatprep.subr.bf16.mxu1 %v691_v21  ;;  %v73_v31 = vld [vmem:[#allocation2 + $0x120] sm:$0xff]  ;;  %v74_v32 = vld [vmem:[#allocation2 + $0x128] sm:$0xff]  ;;  %662 = vmatpush3.bf16.msra.mxu0 %v661_v17  ;;  %v695_v34 = vpack.c.bf16 %v90_v30, %v89_v29  ;;  %v60_v36 = vld [vmem:[#allocation2 + $0xb8] sm:$0xff]  ;;  %v870_v21 = vsub.s32 %v156_v2, %v158_v3 }
  0x1c   :  { %v43_v37 = vld [vmem:[#allocation2 + $0x30] sm:$0xff]  ;;  %664 = vmatprep.subr.bf16.mxu0 %v663_v26  ;;  %v697_v38 = vpack.c.bf16 %v74_v32, %v73_v31  ;;  %v667_v39 = vpack.c.bf16 %v60_v36, %v59_v35  ;;  %v44_v40 = vld [vmem:[#allocation2 + $0x38] sm:$0xff]  ;;  %v61_v46 = vld [vmem:[#allocation2 + $0xc0] sm:$0xff] }
  0x1d   :  { %694 = vmatpush3.bf16.msra.mxu1 %v693_v25  ;;  %v91_v41 = vld [vmem:[#allocation2 + $0x1b0] sm:$0xff]  ;;  %v92_v42 = vld [vmem:[#allocation2 + $0x1b8] sm:$0xff]  ;;  %v62_v47 = vld [vmem:[#allocation2 + $0xc8] sm:$0xff]  ;;  %v669_v48 = vpack.c.bf16 %v44_v40, %v43_v37 }
  0x1e   :  { %696 = vmatprep.subr.bf16.mxu1 %v695_v34  ;;  %v699_v43 = vpack.c.bf16 %v92_v42, %v91_v41  ;;  %v75_v44 = vld [vmem:[#allocation2 + $0x130] sm:$0xff]  ;;  %v76_v45 = vld [vmem:[#allocation2 + $0x138] sm:$0xff]  ;;  %v93_v49 = vld [vmem:[#allocation2 + $0x1c0] sm:$0xff]  ;;  %v671_v55 = vpack.c.bf16 %v62_v47, %v61_v46 }
  0x1f   :  { %666 = vmatpush3.bf16.msra.mxu0 %v665_v33  ;;  %v94_v50 = vld [vmem:[#allocation2 + $0x1c8] sm:$0xff]  ;;  %v701_v54 = vpack.c.bf16 %v76_v45, %v75_v44  ;;  %v45_v56 = vld [vmem:[#allocation2 + $0x40] sm:$0xff]  ;;  %v63_v61 = vld [vmem:[#allocation2 + $0xd0] sm:$0xff] }
  0x20   :  { %668 = vmatprep.subr.bf16.mxu0 %v667_v39  ;;  %v46_v57 = vld [vmem:[#allocation2 + $0x48] sm:$0xff]  ;;  %v77_v58 = vld [vmem:[#allocation2 + $0x140] sm:$0xff]  ;;  %v703_v59 = vpack.c.bf16 %v94_v50, %v93_v49  ;;  %v64_v62 = vld [vmem:[#allocation2 + $0xd8] sm:$0xff] }
  0x21   :  { %698 = vmatpush3.bf16.msra.mxu1 %v697_v38  ;;  %v78_v60 = vld [vmem:[#allocation2 + $0x148] sm:$0xff]  ;;  %v95_v63 = vld [vmem:[#allocation2 + $0x1d0] sm:$0xff]  ;;  %v96_v0 = vld [vmem:[#allocation2 + $0x1d8] sm:$0xff]  ;;  %v673_v1 = vpack.c.bf16 %v46_v57, %v45_v56  ;;  %v675_v5 = vpack.c.bf16 %v64_v62, %v63_v61 }
  0x22   :  { %700 = vmatprep.subr.bf16.mxu1 %v699_v43  ;;  %v705_v4 = vpack.c.bf16 %v78_v60, %v77_v58  ;;  %v47_v6 = vld [vmem:[#allocation2 + $0x50] sm:$0xff]  ;;  %v48_v7 = vld [vmem:[#allocation2 + $0x58] sm:$0xff]  ;;  %v707_v9 = vpack.c.bf16 %v96_v0, %v95_v63  ;;  %v65_v11 = vld [vmem:[#allocation2 + $0xe0] sm:$0xff]  ;;  %v832_v63 = vmov 0.0|0.0  }
  0x23   :  { %670 = vmatpush3.bf16.msra.mxu0 %v669_v48  ;;  %v79_v8 = vld [vmem:[#allocation2 + $0x150] sm:$0xff]  ;;  %v80_v10 = vld [vmem:[#allocation2 + $0x158] sm:$0xff]  ;;  %v66_v12 = vld [vmem:[#allocation2 + $0xe8] sm:$0xff]  ;;  %v677_v17 = vpack.c.bf16 %v48_v7, %v47_v6 }
  0x24   :  { %672 = vmatprep.subr.bf16.mxu0 %v671_v55  ;;  %v49_v13 = vld [vmem:[#allocation2 + $0x60] sm:$0xff]  ;;  %v50_v14 = vld [vmem:[#allocation2 + $0x68] sm:$0xff]  ;;  %v67_v20 = vld [vmem:[#allocation2 + $0xf0] sm:$0xff]  ;;  %v709_v22 = vpack.c.bf16 %v80_v10, %v79_v8  ;;  %v679_v23 = vpack.c.bf16 %v66_v12, %v65_v11  ;;  %v834_v10 = vmov 0.0  }
  0x25   :  { %702 = vmatpush3.bf16.msra.mxu1 %v701_v54  ;;  %v97_v15 = vld [vmem:[#allocation2 + $0x1e0] sm:$0xff]  ;;  %v98_v16 = vld [vmem:[#allocation2 + $0x1e8] sm:$0xff]  ;;  %v68_v25 = vld [vmem:[#allocation2 + $0xf8] sm:$0xff]  ;;  %v681_v30 = vpack.c.bf16 %v50_v14, %v49_v13 }
  0x26   :  { %704 = vmatprep.subr.bf16.mxu1 %v703_v59  ;;  %v81_v18 = vld [vmem:[#allocation2 + $0x160] sm:$0xff]  ;;  %v82_v19 = vld [vmem:[#allocation2 + $0x168] sm:$0xff]  ;;  %v711_v24 = vpack.c.bf16 %v98_v16, %v97_v15  ;;  %v99_v28 = vld [vmem:[#allocation2 + $0x1f0] sm:$0xff]  ;;  %v683_v36 = vpack.c.bf16 %v68_v25, %v67_v20 }
  0x27   :  { %674 = vmatpush3.bf16.msra.mxu0 %v673_v1  ;;  %v764_v26 = vld [vmem:[%s919_s0] ss:$14 sps:$4 sm:$0xff]   ;;  %v766_v27 = vld [vmem:[%s919_s0 + $0x1c] ss:$14 sps:$4 sm:$0xff]   ;;  %v768_v33 = vld [vmem:[%s919_s0 + $0x4] ss:$14 sps:$4 sm:$0xff]   ;;  %v713_v35 = vpack.c.bf16 %v82_v19, %v81_v18 }
  0x28   :  { %676 = vmatprep.subr.bf16.mxu0 %v675_v5  ;;  %v100_v29 = vld [vmem:[#allocation2 + $0x1f8] sm:$0xff]  ;;  %v160_v31 = vrot.slane %v764_v26, %v870_v21  ;;  %v174_v32 = vrot.slane %v766_v27, %v870_v21  ;;  %v769_v34 = vld [vmem:[%s919_s0 + $0x20] ss:$14 sps:$4 sm:$0xff]   ;;  %v167_v45 = vrot.slane %v768_v33, %v870_v21  ;;  %v773_v7 = vld [vmem:[%s919_s0 + $0x24] ss:$14 sps:$4 sm:$0xff]  }
  0x29   :  { %706 = vmatpush3.bf16.msra.mxu1 %v705_v4  ;;  %v51_v37 = vld [vmem:[#allocation2 + $0x70] sm:$0xff]  ;;  %v52_v38 = vld [vmem:[#allocation2 + $0x78] sm:$0xff]  ;;  %v715_v40 = vpack.c.bf16 %v100_v29, %v99_v28  ;;  %v117_v43 = vld [vmem:[#allocation2 + $0x280] sm:$0xff]  ;;  %v181_v46 = vrot.slane %v769_v34, %v870_v21  ;;  %v210_v16 = vrot.slane %v773_v7, %v870_v21 }
  0x2a   :  { %708 = vmatprep.subr.bf16.mxu1 %v707_v9  ;;  %v83_v39 = vld [vmem:[#allocation2 + $0x170] sm:$0xff]  ;;  %v183_v41 = vcombine.high %v160_v31, %v174_v32  ;;  %v84_v42 = vld [vmem:[#allocation2 + $0x178] sm:$0xff]  ;;  %v118_v44 = vld [vmem:[#allocation2 + $0x288] sm:$0xff]  ;;  %v685_v47 = vpack.c.bf16 %v52_v38, %v51_v37  ;;  %v182_v55 = vcombine.low %v160_v31, %v174_v32 }
  0x2b   :  { %678 = vmatpush3.bf16.msra.mxu0 %v677_v17  ;;  %v185_v48 = vcombine.high %v167_v45, %v181_v46  ;;  %v717_v49 = vpack.c.bf16 %v84_v42, %v83_v39  ;;  %v719_v50 = vpack.c.bf16 %v118_v44, %v117_v43  ;;  %v101_v51 = vld [vmem:[#allocation2 + $0x200] sm:$0xff]  ;;  %v102_v52 = vld [vmem:[#allocation2 + $0x208] sm:$0xff]  ;;  %v119_v53 = vld [vmem:[#allocation2 + $0x290] sm:$0xff]  ;;  %v184_v57 = vcombine.low %v167_v45, %v181_v46 }
  0x2c   :  { %680 = vmatprep.subr.bf16.mxu0 %v679_v23  ;;  %294 = vmatprep.mubr.f32.mxu0 %v183_v41  ;;  %v120_v54 = vld [vmem:[#allocation2 + $0x298] sm:$0xff]  ;;  %v721_v56 = vpack.c.bf16 %v102_v52, %v101_v51  ;;  %v103_v59 = vld [vmem:[#allocation2 + $0x210] sm:$0xff]  ;;  %v121_v61 = vld [vmem:[#allocation2 + $0x2a0] sm:$0xff] }
  0x2d   :  { %710 = vmatpush3.bf16.msra.mxu1 %v709_v22  ;;  %364 = vmatprep.mubr.f32.mxu1 %v185_v48  ;;  %v723_v58 = vpack.c.bf16 %v120_v54, %v119_v53  ;;  %v104_v60 = vld [vmem:[#allocation2 + $0x218] sm:$0xff]  ;;  %v122_v62 = vld [vmem:[#allocation2 + $0x2a8] sm:$0xff]  ;;  %v105_v0 = vld [vmem:[#allocation2 + $0x220] sm:$0xff] }
  0x2e   :  { %712 = vmatprep.subr.bf16.mxu1 %v711_v24  ;;  %v106_v1 = vld [vmem:[#allocation2 + $0x228] sm:$0xff]  ;;  %v725_v2 = vpack.c.bf16 %v104_v60, %v103_v59  ;;  %v133_v5 = vld [vmem:[#allocation2 + $0x300] sm:$0xff]  ;;  %v727_v6 = vpack.c.bf16 %v122_v62, %v121_v61  ;;  %v123_v11 = vld [vmem:[#allocation2 + $0x2b0] sm:$0xff] }
  0x2f   :  { %682 = vmatpush3.bf16.msra.mxu0 %v681_v30  ;;  %v770_v3 = vld [vmem:[%s919_s0 + $0x8] ss:$14 sps:$4 sm:$0xff]   ;;  %v772_v4 = vld [vmem:[%s919_s0 + $0xc] ss:$14 sps:$4 sm:$0x33]   ;;  %v729_v18 = vpack.c.bf16 %v106_v1, %v105_v0  ;;  %v125_v25 = vld [vmem:[#allocation2 + $0x2c0] sm:$0xff] }
  0x30   :  { %684 = vmatprep.subr.bf16.mxu0 %v683_v36  ;;  %v775_v8 = vld [vmem:[%s919_s0 + $0x28] ss:$14 sps:$4 sm:$0x33]   ;;  %v124_v12 = vld [vmem:[#allocation2 + $0x2b8] sm:$0xff]  ;;  %v196_v13 = vrot.slane %v770_v3, %v870_v21  ;;  %v203_v14 = vrot.slane %v772_v4, %v870_v21  ;;  %v109_v29 = vld [vmem:[#allocation2 + $0x240] sm:$0xff] }
  0x31   :  { %714 = vmatpush3.bf16.msra.mxu1 %v713_v35  ;;  %v134_v9 = vld [vmem:[#allocation2 + $0x308] sm:$0xff]  ;;  %v217_v17 = vrot.slane %v775_v8, %v870_v21  ;;  %v731_v19 = vpack.c.bf16 %v124_v12, %v123_v11  ;;  %v107_v20 = vld [vmem:[#allocation2 + $0x230] sm:$0xff]  ;;  %v108_v22 = vld [vmem:[#allocation2 + $0x238] sm:$0xff] }
  0x32   :  { %716 = vmatprep.subr.bf16.mxu1 %v715_v40  ;;  %v752_v15 = vpack.c.bf16 %v134_v9, %v133_v5  ;;  %v219_v23 = vcombine.high %v196_v13, %v210_v16  ;;  %v126_v26 = vld [vmem:[#allocation2 + $0x2c8] sm:$0xff]  ;;  %v733_v27 = vpack.c.bf16 %v108_v22, %v107_v20  ;;  %v127_v30 = vld [vmem:[#allocation2 + $0x2d0] sm:$0xff]  ;;  %v128_v31 = vld [vmem:[#allocation2 + $0x2d8] sm:$0xff] }
  0x33   :  { %686 = vmatpush3.bf16.msra.mxu0 %v685_v47  ;;  %v220_v24 = vcombine.low %v203_v14, %v217_v17  ;;  %v735_v28 = vpack.c.bf16 %v126_v26, %v125_v25  ;;  %v110_v21 = vld [vmem:[#allocation2 + $0x248] sm:$0xff]  ;;  %v739_v33 = vpack.c.bf16 %v128_v31, %v127_v30  ;;  %v111_v34 = vld [vmem:[#allocation2 + $0x250] sm:$0xff]  ;;  %v112_v35 = vld [vmem:[#allocation2 + $0x258] sm:$0xff] }
  0x34   :  { %720 = vmatprep.subr.bf16.mxu0 %v719_v50  ;;  %v737_v32 = vpack.c.bf16 %v110_v21, %v109_v29  ;;  %v129_v36 = vld [vmem:[#allocation2 + $0x2e0] sm:$0xff]  ;;  %v130_v37 = vld [vmem:[#allocation2 + $0x2e8] sm:$0xff]  ;;  %v741_v38 = vpack.c.bf16 %v112_v35, %v111_v34  ;;  %v131_v42 = vld [vmem:[#allocation2 + $0x2f0] sm:$0xff] }
  0x35   :  { %718 = vmatpush3.bf16.msra.mxu1 %v717_v49  ;;  %v743_v39 = vpack.c.bf16 %v130_v37, %v129_v36  ;;  %v113_v40 = vld [vmem:[#allocation2 + $0x260] sm:$0xff]  ;;  %v114_v41 = vld [vmem:[#allocation2 + $0x268] sm:$0xff]  ;;  %v132_v43 = vld [vmem:[#allocation2 + $0x2f8] sm:$0xff]  ;;  %v218_v49 = vcombine.low %v196_v13, %v210_v16 }
  0x36   :  { %751 = vmatprep.subr.bf16.mxu1 %v832_v63  ;;  %295 = vmatmul.mubr.f32.vlgmr.msra.gmra.mrb[0].mxu0 %v182_v55  ;;  %v745_v44 = vpack.c.bf16 %v114_v41, %v113_v40  ;;  %v747_v45 = vpack.c.bf16 %v132_v43, %v131_v42  ;;  %v115_v46 = vld [vmem:[#allocation2 + $0x270] sm:$0xff]  ;;  %v116_v47 = vld [vmem:[#allocation2 + $0x278] sm:$0xff]  ;;  %v538_v51 = vld [vmem:[%s921_s2] ss:$0 sm:$0xff] }
  0x37   :  { %722 = vmatpush3.bf16.msra.mxu0 %v721_v56  ;;  %434 = vmatprep.mubr.f32.mxu0 %v219_v23  ;;  %v749_v48 = vpack.c.bf16 %v116_v47, %v115_v46 }
  0x38   :  { %365 = vmatmul.mubr.f32.vlgmr.msra.gmra.mrb[0].mxu1 %v184_v57  ;;  %724 = vmatprep.subr.bf16.mxu0 %v723_v58 }
  0x39   :  { %652 = vmatprep.mubr.msk.f32.mxu1 %vm833_vm0, %v834_v10  ;;  %753 = vmatpush3.bf16.msra.mxu1 %v752_v15 }
  0x3b   :  { %726 = vmatpush3.bf16.msra.mxu0 %v725_v2 }
  0x3c   :  { %728 = vmatprep.subr.bf16.mxu0 %v727_v6  ;;  %653 = vmatmul.mubr.msk.f32.vlgmr.msra.gmra.mrb[2].mxu1 %vm227_vm1, %v220_v24 }
  0x3f   :  { %730 = vmatpush3.bf16.msra.mxu0 %v729_v18 }
  0x40   :  { %732 = vmatprep.subr.bf16.mxu0 %v731_v19 }
  0x43   :  { %734 = vmatpush3.bf16.msra.mxu0 %v733_v27 }
  0x44   :  { %736 = vmatprep.subr.bf16.mxu0 %v735_v28 }
  0x47   :  { %738 = vmatpush3.bf16.msra.mxu0 %v737_v32 }
  0x48   :  { %740 = vmatprep.subr.bf16.mxu0 %v739_v33 }
  0x4b   :  { %742 = vmatpush3.bf16.msra.mxu0 %v741_v38 }
  0x4c   :  { %744 = vmatprep.subr.bf16.mxu0 %v743_v39 }
  0x4f   :  { %746 = vmatpush3.bf16.msra.mxu0 %v745_v44 }
  0x50   :  { %748 = vmatprep.subr.bf16.mxu0 %v747_v45 }
  0x53   :  { %750 = vmatpush3.bf16.msra.mxu0 %v749_v48 }
  0x56   :  { %435 = vmatmul.mubr.f32.vlgmr.msra.gmra.mrb[2].mxu0 %v218_v49 }
 0x109   :  { %v572_v50 = vpop.f32.mrb[0].mxu0 }
 0x10a   :  { %v573_v52 = vpop.f32.mrb[1].mxu0 }
 0x10b   :  { %v607_v53 = vpop.f32.mrb[0].mxu1  ;;  %v574_v54 = vadd.f32 %v573_v52, %v572_v50 }
 0x10c   :  { %v608_v55 = vpop.f32.mrb[1].mxu1 }
 0x10d   :  { %v609_v56 = vadd.f32 %v608_v55, %v607_v53  ;;  %v297_v57 = vadd.f32 %v574_v54, %v538_v51 }
 0x10f   :  { %v367_v58 = vadd.f32 %v609_v56, %v297_v57  ;;  %v506_v59 = vpop.f32.mrb[2].mxu1 }
 0x110   :  { %v654_v60 = vpop.f32.mrb[3].mxu1 }
 0x129   :  { %v642_v61 = vpop.f32.mrb[2].mxu0 }
 0x12a   :  { %v643_v62 = vpop.f32.mrb[3].mxu0 }
 0x12b   :  { %v644_v63 = vadd.f32 %v643_v62, %v642_v61 }
 0x12d   :  { %v437_v0 = vadd.f32 %v644_v63, %v367_v58 }
 0x12f   :  { %v507_v1 = vadd.f32 %v506_v59, %v437_v0 }
 0x131   :  { %510 = vmax.xlane.f32.xlu0 %v507_v1 }
 0x1be   :  { %v511_v2 = vpop.xlane.xlu0 %510 }
 0x1bf   :  { %v512_v3 = vsub.f32 %v507_v1, %v511_v2 }
 0x1c1   :  { %v513_v4 = vmul.f32 1.442695, %v512_v3 }
 0x1c3   :  { %776 = vpow2.f32 %v513_v4 }
 0x1cd   :  { %v777_v5 = vpop.eup %776 }
 0x1ce   :  { %515 = vadd.xlane.f32.xlu0 %v777_v5 }
 0x25b   :  { %v516_v6 = vpop.xlane.xlu0 %515 }
 0x25c   :  { %778 = vlog2.f32 %v516_v6 }
 0x266   :  { %v779_v7 = vpop.eup %778 }
 0x267   :  { %v518_v8 = vmul.f32 0.6931472, %v779_v7 }
 0x269   :  { %v519_v9 = vsub.f32 %v512_v3, %v518_v8 }
 0x26b   :  { %520 = vst [vmem:[#allocation5] sm:$0xff] %v519_v9 }
 0x26c   :  { %525 = vsyncadd [#allocation4], 96  ;;  %s835_s2 = smov [#allocation5]  }
 0x26d   :  { %s526_s15 = sshll.u32 %s835_s2, 4  ;;  %s527_s15 = int_to_ptr.vmem [resolvable:$true] %s526_s15 }
 0x26e   :  { %s802_s16 = scalar_lea.vmem %s527_s15, 32  ;;  %s806_s17 = scalar_lea.vmem %s527_s15, 128 }
 0x26f   :  { %p803_p8 = scmp.ne.s32.totalorder %s527_s15, %s802_s16  ;;  %p807_p9 = scmp.lt.s32.totalorder %s527_s15, %s527_s15 }
 0x270   :  { %p808_p10 = scmp.lt.s32.totalorder %s806_s17, %s802_s16 }
 0x272   :  { %p809_p11 = por %p808_p10, %p807_p9 }
 0x274   :  { %p810_p12 = pnand %p809_p11, %p803_p8 }
 0x276   :  { %813 = shalt.err (!%p810_p12)
}
 0x277   :  { %s814_s20 = scalar_lea.hbm %s922_s3, 32 }
 0x278   :  { %p815_p13 = scmp.ne.s32.totalorder %s922_s3, %s814_s20  ;;  %p818_p0 = scmp.lt.u32.totalorder %s814_s20, %s922_s3 }
 0x27a   :  { %p820_p1 = pnand %p818_p0, %p815_p13 }
 0x27c   :  { %823 = shalt.err (!%p820_p1)
}
 0x27d   :  { %s836_s25 = smov 32   ;;  %s837_s1 = smov 2  }
 0x27e   :  { %532 = dma.vmem_to_hbm [thread:$0]  %s527_s15, 32, %s922_s3, [#allocation4], %s836_s25, %s836_s25, %s837_s1  }
 0x27f   :  { %826 = dma.done.wait [#allocation4], 128  }
 0x280   :  { %827 = vsyncadd [#allocation4], 4294967168 }
 0x281   :  { %536 = vsyncpa [#allocation3], 1 }
 0x282   :  { %537 = vsyncpa [#allocation4], 1 }

</bundles_post_ra>
